<compile_context>
chip_gen: v5e
topology: v5e:2x2
jax: 0.10.0
libtpu: 0.0.40
codegen_flags: <defaults>
</compile_context>

<pallas_src>
import math

import jax
import jax.numpy as jnp
from jax.experimental import pallas as pl
from jax.experimental.pallas import tpu as pltpu

# -----------------------------------------------------------------------------
# Model hyper-parameters (small, consistent with the module's __init__)
# -----------------------------------------------------------------------------
D_MODEL = 32          # d_model
NHEAD = 4             # nhead
HEAD_DIM = D_MODEL // NHEAD
DIM_FF = 64           # dim_feedforward
SEQ_LEN = 8           # L
BATCH = 2             # N
LN_EPS = 1e-5
NL = BATCH * SEQ_LEN          # flattened (batch * seq) rows
NGROUPS = NHEAD * BATCH       # head-batched attention groups, g = h*BATCH + n


def _layer_norm(y, gamma, beta):
    mean = jnp.mean(y, axis=-1, keepdims=True)
    var = jnp.mean((y - mean) ** 2, axis=-1, keepdims=True)
    return (y - mean) * jax.lax.rsqrt(var + LN_EPS) * gamma + beta


def encoder_layer_kernel(
    x_ref,          # (L, N, E) f32   PyTorch (seq, batch, embed) layout
    wqkv_ref,       # (E, 3E)   bf16  in_proj_weight^T, 1/sqrt(HD) folded into Q cols
    bqkv_ref,       # (1, 3E)   f32
    wo_ref,         # (E, E)    bf16  out_proj.weight^T
    bo_ref,         # (1, E)    f32
    w1_ref,         # (E, FF)   bf16  linear1.weight^T
    b1_ref,         # (1, FF)   f32
    w2_ref,         # (FF, E)   bf16  linear2.weight^T
    b2_ref,         # (1, E)    f32
    g1_ref,         # (1, E)    f32   norm1.weight
    be1_ref,        # (1, E)    f32   norm1.bias
    g2_ref,         # (1, E)    f32   norm2.weight
    be2_ref,        # (1, E)    f32   norm2.bias
    out_ref,        # (L, N, E) f32
    scores_ref,     # (N, L, L) f32
):
    N, L, E, H, HD = BATCH, SEQ_LEN, D_MODEL, NHEAD, HEAD_DIM
    bf16 = jnp.bfloat16

    # ---- layout permute absorbed into the kernel (tiny VMEM shuffle) ----
    x = jnp.transpose(x_ref[...], (1, 0, 2))                 # (N, L, E)
    xf = x.reshape(N * L, E)                                  # rows ordered (n, l)

    # ---- fused QKV projection: bf16 MXU operands, f32 accumulation ----
    qkv = jnp.dot(xf.astype(bf16), wqkv_ref[...],
                  preferred_element_type=jnp.float32) + bqkv_ref[...]   # (NL, 3E)
    q = qkv[:, :E]                       # Q already scaled by 1/sqrt(HD) (folded)
    k = qkv[:, E:2 * E]
    v = qkv[:, 2 * E:]

    # ---- head-batched regroup: (NL, E) -> (H*N, L, HD), group g = h*N + n ----
    def group_heads(t):
        return jnp.concatenate(
            [t[:, h * HD:(h + 1) * HD].reshape(N, L, HD) for h in range(H)],
            axis=0)

    qh = group_heads(q).astype(bf16)
    kh = group_heads(k).astype(bf16)
    vh = group_heads(v).astype(bf16)

    # ---- ONE batched QK^T, ONE softmax, ONE PV product ----
    s = jnp.einsum('gqd,gkd->gqk', qh, kh,
                   preferred_element_type=jnp.float32)        # (G, L, L) f32
    s = s - jnp.max(s, axis=-1, keepdims=True)
    p = jnp.exp(s)
    denom = jnp.sum(p, axis=-1, keepdims=True)
    r = pl.reciprocal(denom, approx=True)                     # EUP vrcp (idle slot)
    r = r * (2.0 - denom * r)                                 # 1 Newton step -> ~1e-8 rel err
    p = p * r                                                 # row sums == 1

    # averaged attention weights (PyTorch average_attn_weights=True)
    scores_ref[...] = (jnp.sum(p.reshape(H, N, L, L), axis=0)
                       * (1.0 / H)).astype(scores_ref.dtype)

    oh = jnp.einsum('gqk,gkd->gqd', p.astype(bf16), vh,
                    preferred_element_type=jnp.float32)       # (G, L, HD) f32

    # ---- lane-concat heads back to (NL, E) slab; single K=E out-projection ----
    o_slab = jnp.concatenate(
        [oh[h * N:(h + 1) * N].reshape(N * L, HD) for h in range(H)], axis=1)
    attn = jnp.dot(o_slab.astype(bf16), wo_ref[...],
                   preferred_element_type=jnp.float32) + bo_ref[...]    # (NL, E)

    # ---- residual + layernorm 1 (dropout1 identity in eval) ----
    y = _layer_norm(xf + attn, g1_ref[...], be1_ref[...])               # (NL, E)

    # ---- feed-forward: linear1 -> relu -> linear2 (dropout identity) ----
    f = jnp.dot(y.astype(bf16), w1_ref[...],
                preferred_element_type=jnp.float32) + b1_ref[...]
    f = jnp.maximum(f, 0.0)
    f = jnp.dot(f.astype(bf16), w2_ref[...],
                preferred_element_type=jnp.float32) + b2_ref[...]

    # ---- residual + layernorm 2 (dropout2 identity in eval) ----
    z = _layer_norm(y + f, g2_ref[...], be2_ref[...])

    # write directly in PyTorch (L, N, E) layout
    out_ref[...] = jnp.transpose(z.reshape(N, L, E), (1, 0, 2)).astype(out_ref.dtype)


def transformer_encoder_layer(src, params):
    """src: (L, N, E) float32.  Returns (out (L, N, E), scores (N, L, L))."""
    L, N, E = src.shape
    assert (L, N, E) == (SEQ_LEN, BATCH, D_MODEL)

    vmem = pl.BlockSpec(memory_space=pltpu.MemorySpace.VMEM)

    flops = (2 * NL * E * 3 * E                                   # QKV proj
             + 4 * NGROUPS * SEQ_LEN * SEQ_LEN * HEAD_DIM         # QK^T + PV
             + 2 * NL * E * E                                     # out proj
             + 2 * NL * (E * DIM_FF + DIM_FF * E))                # FFN
    transcendentals = (NGROUPS * SEQ_LEN * SEQ_LEN                # exp
                       + NGROUPS * SEQ_LEN                        # vrcp
                       + 2 * NL)                                  # layernorm rsqrt
    weight_bytes = (2 * (E * 3 * E + E * E + E * DIM_FF + DIM_FF * E)   # bf16 weights
                    + 4 * (3 * E + E + DIM_FF + E + 4 * E))             # f32 bias / LN
    bytes_accessed = 4 * (2 * N * L * E + N * L * L) + weight_bytes

    out, scores = pl.pallas_call(
        encoder_layer_kernel,
        out_shape=(
            jax.ShapeDtypeStruct((L, N, E), jnp.float32),
            jax.ShapeDtypeStruct((N, L, L), jnp.float32),
        ),
        in_specs=[vmem] * 13,               # no grid: single invocation, no pipelining scaffolding
        out_specs=(vmem, vmem),
        cost_estimate=pl.CostEstimate(
            flops=flops,
            transcendentals=transcendentals,
            bytes_accessed=bytes_accessed),
    )(
        src,
        params["wqkv_t"], params["bqkv"],
        params["wo_t"], params["bo"],
        params["w1_t"], params["b1"],
        params["w2_t"], params["b2"],
        params["g1"], params["be1"],
        params["g2"], params["be2"],
    )
    return out, scores


# -----------------------------------------------------------------------------
# Parameter construction (PyTorch layout) + kernel-layout prep
# -----------------------------------------------------------------------------
def init_raw_params(key):
    ks = jax.random.split(key, 8)
    E, FF = D_MODEL, DIM_FF
    return {
        "in_proj_w": jax.random.normal(ks[0], (3 * E, E), jnp.float32) * 0.1,
        "in_proj_b": jax.random.normal(ks[1], (3 * E,), jnp.float32) * 0.1,
        "out_proj_w": jax.random.normal(ks[2], (E, E), jnp.float32) * 0.1,
        "out_proj_b": jax.random.normal(ks[3], (E,), jnp.float32) * 0.1,
        "w1": jax.random.normal(ks[4], (FF, E), jnp.float32) * 0.1,
        "b1": jax.random.normal(ks[5], (FF,), jnp.float32) * 0.1,
        "w2": jax.random.normal(ks[6], (E, FF), jnp.float32) * 0.1,
        "b2": jax.random.normal(ks[7], (E,), jnp.float32) * 0.1,
        "g1": jnp.ones((E,), jnp.float32),
        "be1": jnp.zeros((E,), jnp.float32),
        "g2": jnp.ones((E,), jnp.float32),
        "be2": jnp.zeros((E,), jnp.float32),
    }


def prep_kernel_params(raw):
    """Transpose weights for (x @ W^T) layout, fold 1/sqrt(HD) into Q, cast weights bf16."""
    E = D_MODEL
    bf16 = jnp.bfloat16
    scale = 1.0 / math.sqrt(HEAD_DIM)
    wq, wk, wv = raw["in_proj_w"][:E], raw["in_proj_w"][E:2 * E], raw["in_proj_w"][2 * E:]
    bq, bk, bv = raw["in_proj_b"][:E], raw["in_proj_b"][E:2 * E], raw["in_proj_b"][2 * E:]
    return {
        "wqkv_t": jnp.concatenate([wq.T * scale, wk.T, wv.T], axis=1).astype(bf16),  # (E, 3E)
        "bqkv": jnp.concatenate([bq * scale, bk, bv]).reshape(1, 3 * E),
        "wo_t": raw["out_proj_w"].T.astype(bf16),                                    # (E, E)
        "bo": raw["out_proj_b"].reshape(1, E),
        "w1_t": raw["w1"].T.astype(bf16),                                            # (E, FF)
        "b1": raw["b1"].reshape(1, DIM_FF),
        "w2_t": raw["w2"].T.astype(bf16),                                            # (FF, E)
        "b2": raw["b2"].reshape(1, E),
        "g1": raw["g1"].reshape(1, E),
        "be1": raw["be1"].reshape(1, E),
        "g2": raw["g2"].reshape(1, E),
        "be2": raw["be2"].reshape(1, E),
    }


# -----------------------------------------------------------------------------
# Pure-JAX reference (PyTorch TransformerEncoderLayer forward, eval mode, f32)
# -----------------------------------------------------------------------------
def reference_encoder_layer(src, raw):
    L, N, E = src.shape
    H, HD = NHEAD, HEAD_DIM
    x = jnp.transpose(src, (1, 0, 2))                       # (N, L, E)
    qkv = x @ raw["in_proj_w"].T + raw["in_proj_b"]         # (N, L, 3E)
    q, k, v = qkv[..., :E], qkv[..., E:2 * E], qkv[..., 2 * E:]

    def split(t):                                           # (N, L, E) -> (N, H, L, HD)
        return t.reshape(N, L, H, HD).transpose(0, 2, 1, 3)

    qh = split(q) * (1.0 / math.sqrt(HD))
    kh, vh = split(k), split(v)
    s = jnp.einsum("nhqd,nhkd->nhqk", qh, kh)
    p = jax.nn.softmax(s, axis=-1)
    o = jnp.einsum("nhqk,nhkd->nhqd", p, vh)
    o = o.transpose(0, 2, 1, 3).reshape(N, L, E)
    attn = o @ raw["out_proj_w"].T + raw["out_proj_b"]

    def ln(t, g, b):
        m = jnp.mean(t, axis=-1, keepdims=True)
        var = jnp.mean((t - m) ** 2, axis=-1, keepdims=True)
        return (t - m) * jax.lax.rsqrt(var + LN_EPS) * g + b

    y = ln(x + attn, raw["g1"], raw["be1"])
    f = jnp.maximum(y @ raw["w1"].T + raw["b1"], 0.0)
    f = f @ raw["w2"].T + raw["b2"]
    z = ln(y + f, raw["g2"], raw["be2"])
    return jnp.transpose(z, (1, 0, 2)), jnp.mean(p, axis=1)


if __name__ == "__main__":
    key = jax.random.PRNGKey(0)
    k_src, k_par = jax.random.split(key)
    src = jax.random.normal(k_src, (SEQ_LEN, BATCH, D_MODEL), jnp.float32)
    raw = init_raw_params(k_par)
    params = prep_kernel_params(raw)

    out, scores = jax.jit(transformer_encoder_layer)(src, params)
    jax.block_until_ready((out, scores))

    ref_out, ref_scores = reference_encoder_layer(src, raw)

    assert out.shape == (SEQ_LEN, BATCH, D_MODEL)
    assert scores.shape == (BATCH, SEQ_LEN, SEQ_LEN)
    assert bool(jnp.all(jnp.isfinite(out))) and bool(jnp.all(jnp.isfinite(scores)))
    # attention rows must sum to 1 (Newton-refined reciprocal keeps normalization tight)
    assert bool(jnp.allclose(jnp.sum(scores, axis=-1), 1.0, atol=1e-4))
    # match the pure-f32 reference; tolerance covers bf16 MXU operands (f32 accumulation)
    assert bool(jnp.allclose(out, ref_out, atol=3e-2, rtol=3e-2))
    assert bool(jnp.allclose(scores, ref_scores, atol=2e-2, rtol=2e-2))
    print("KERNEL_OK")
</pallas_src>

<mosaic_0001>
module attributes {stable_mosaic.version = 11 : i64} {
  func.func @encoder_layer_kernel(%arg0: memref<8x2x32xf32, #tpu.memory_space<vmem>>, %arg1: memref<32x96xbf16, #tpu.memory_space<vmem>>, %arg2: memref<1x96xf32, #tpu.memory_space<vmem>>, %arg3: memref<32x32xbf16, #tpu.memory_space<vmem>>, %arg4: memref<1x32xf32, #tpu.memory_space<vmem>>, %arg5: memref<32x64xbf16, #tpu.memory_space<vmem>>, %arg6: memref<1x64xf32, #tpu.memory_space<vmem>>, %arg7: memref<64x32xbf16, #tpu.memory_space<vmem>>, %arg8: memref<1x32xf32, #tpu.memory_space<vmem>>, %arg9: memref<1x32xf32, #tpu.memory_space<vmem>>, %arg10: memref<1x32xf32, #tpu.memory_space<vmem>>, %arg11: memref<1x32xf32, #tpu.memory_space<vmem>>, %arg12: memref<1x32xf32, #tpu.memory_space<vmem>>, %arg13: memref<8x2x32xf32, #tpu.memory_space<vmem>>, %arg14: memref<2x8x8xf32, #tpu.memory_space<vmem>>) attributes {dimension_semantics = [], scalar_prefetch = 0 : i64, scratch_operands = 0 : i64, tpu.core_type = #tpu.core_type<tc>} {
    %c0 = arith.constant 0 : index
    %c0_0 = arith.constant 0 : index
    %c0_1 = arith.constant 0 : index
    %0 = vector.load %arg0[%c0, %c0_0, %c0_1] : memref<8x2x32xf32, #tpu.memory_space<vmem>>, vector<8x2x32xf32>
    %1 = tpu.transpose %0, [1, 0, 2] : vector<8x2x32xf32> -> vector<2x8x32xf32>
    %2 = vector.shape_cast %1 : vector<2x8x32xf32> to vector<16x32xf32>
    %3 = arith.truncf %2 : vector<16x32xf32> to vector<16x32xbf16>
    %c0_2 = arith.constant 0 : index
    %c0_3 = arith.constant 0 : index
    %4 = vector.load %arg1[%c0_2, %c0_3] : memref<32x96xbf16, #tpu.memory_space<vmem>>, vector<32x96xbf16>
    %cst = arith.constant dense<0.000000e+00> : vector<16x96xf32>
    %5 = tpu.matmul %3, %4, %cst {dimension_numbers = #tpu.dot_dimension_numbers<[1], [0], [0], [1], [0, 0, 1, 1], [], []>} : vector<16x32xbf16>, vector<32x96xbf16>, vector<16x96xf32> -> vector<16x96xf32>
    %c0_4 = arith.constant 0 : index
    %c0_5 = arith.constant 0 : index
    %6 = vector.load %arg2[%c0_4, %c0_5] : memref<1x96xf32, #tpu.memory_space<vmem>>, vector<1x96xf32>
    %7 = vector.broadcast %6 : vector<1x96xf32> to vector<16x96xf32>
    %8 = arith.addf %5, %7 : vector<16x96xf32>
    %9 = vector.extract_strided_slice %8 {offsets = [0, 0], sizes = [16, 32], strides = [1, 1]} : vector<16x96xf32> to vector<16x32xf32>
    %10 = vector.extract_strided_slice %8 {offsets = [0, 32], sizes = [16, 32], strides = [1, 1]} : vector<16x96xf32> to vector<16x32xf32>
    %11 = vector.extract_strided_slice %8 {offsets = [0, 64], sizes = [16, 32], strides = [1, 1]} : vector<16x96xf32> to vector<16x32xf32>
    %12 = vector.extract_strided_slice %9 {offsets = [0, 0], sizes = [16, 8], strides = [1, 1]} : vector<16x32xf32> to vector<16x8xf32>
    %13 = vector.shape_cast %12 : vector<16x8xf32> to vector<2x8x8xf32>
    %14 = vector.extract_strided_slice %9 {offsets = [0, 8], sizes = [16, 8], strides = [1, 1]} : vector<16x32xf32> to vector<16x8xf32>
    %15 = vector.shape_cast %14 : vector<16x8xf32> to vector<2x8x8xf32>
    %16 = vector.extract_strided_slice %9 {offsets = [0, 16], sizes = [16, 8], strides = [1, 1]} : vector<16x32xf32> to vector<16x8xf32>
    %17 = vector.shape_cast %16 : vector<16x8xf32> to vector<2x8x8xf32>
    %18 = vector.extract_strided_slice %9 {offsets = [0, 24], sizes = [16, 8], strides = [1, 1]} : vector<16x32xf32> to vector<16x8xf32>
    %19 = vector.shape_cast %18 : vector<16x8xf32> to vector<2x8x8xf32>
    %20 = tpu.concatenate %13, %15, %17, %19 in 0 : vector<2x8x8xf32>, vector<2x8x8xf32>, vector<2x8x8xf32>, vector<2x8x8xf32> -> vector<8x8x8xf32>
    %21 = arith.truncf %20 : vector<8x8x8xf32> to vector<8x8x8xbf16>
    %22 = vector.extract_strided_slice %10 {offsets = [0, 0], sizes = [16, 8], strides = [1, 1]} : vector<16x32xf32> to vector<16x8xf32>
    %23 = vector.shape_cast %22 : vector<16x8xf32> to vector<2x8x8xf32>
    %24 = vector.extract_strided_slice %10 {offsets = [0, 8], sizes = [16, 8], strides = [1, 1]} : vector<16x32xf32> to vector<16x8xf32>
    %25 = vector.shape_cast %24 : vector<16x8xf32> to vector<2x8x8xf32>
    %26 = vector.extract_strided_slice %10 {offsets = [0, 16], sizes = [16, 8], strides = [1, 1]} : vector<16x32xf32> to vector<16x8xf32>
    %27 = vector.shape_cast %26 : vector<16x8xf32> to vector<2x8x8xf32>
    %28 = vector.extract_strided_slice %10 {offsets = [0, 24], sizes = [16, 8], strides = [1, 1]} : vector<16x32xf32> to vector<16x8xf32>
    %29 = vector.shape_cast %28 : vector<16x8xf32> to vector<2x8x8xf32>
    %30 = tpu.concatenate %23, %25, %27, %29 in 0 : vector<2x8x8xf32>, vector<2x8x8xf32>, vector<2x8x8xf32>, vector<2x8x8xf32> -> vector<8x8x8xf32>
    %31 = arith.truncf %30 : vector<8x8x8xf32> to vector<8x8x8xbf16>
    %32 = vector.extract_strided_slice %11 {offsets = [0, 0], sizes = [16, 8], strides = [1, 1]} : vector<16x32xf32> to vector<16x8xf32>
    %33 = vector.shape_cast %32 : vector<16x8xf32> to vector<2x8x8xf32>
    %34 = vector.extract_strided_slice %11 {offsets = [0, 8], sizes = [16, 8], strides = [1, 1]} : vector<16x32xf32> to vector<16x8xf32>
    %35 = vector.shape_cast %34 : vector<16x8xf32> to vector<2x8x8xf32>
    %36 = vector.extract_strided_slice %11 {offsets = [0, 16], sizes = [16, 8], strides = [1, 1]} : vector<16x32xf32> to vector<16x8xf32>
    %37 = vector.shape_cast %36 : vector<16x8xf32> to vector<2x8x8xf32>
    %38 = vector.extract_strided_slice %11 {offsets = [0, 24], sizes = [16, 8], strides = [1, 1]} : vector<16x32xf32> to vector<16x8xf32>
    %39 = vector.shape_cast %38 : vector<16x8xf32> to vector<2x8x8xf32>
    %40 = tpu.concatenate %33, %35, %37, %39 in 0 : vector<2x8x8xf32>, vector<2x8x8xf32>, vector<2x8x8xf32>, vector<2x8x8xf32> -> vector<8x8x8xf32>
    %41 = arith.truncf %40 : vector<8x8x8xf32> to vector<8x8x8xbf16>
    "tpu.trace_start"() <{level = 10 : i32, message = "gqd,gkd->gqk"}> : () -> ()
    %cst_6 = arith.constant dense<0.000000e+00> : vector<8x8x8xf32>
    %42 = tpu.matmul %21, %31, %cst_6 {dimension_numbers = #tpu.dot_dimension_numbers<[2], [2], [1], [1], [0, 0, 0, 1, 1, 1], [0], [0]>} : vector<8x8x8xbf16>, vector<8x8x8xbf16>, vector<8x8x8xf32> -> vector<8x8x8xf32>
    "tpu.trace_stop"() : () -> ()
    %cst_7 = arith.constant dense<0xFF800000> : vector<8x8xf32>
    %43 = vector.multi_reduction <maximumf>, %42, %cst_7 [2] : vector<8x8x8xf32> to vector<8x8xf32>
    %44 = vector.shape_cast %43 : vector<8x8xf32> to vector<8x8x1xf32>
    %45 = vector.broadcast %44 : vector<8x8x1xf32> to vector<8x8x8xf32>
    %46 = arith.subf %42, %45 : vector<8x8x8xf32>
    %47 = math.exp %46 : vector<8x8x8xf32>
    %cst_8 = arith.constant dense<0.000000e+00> : vector<8x8xf32>
    %48 = vector.multi_reduction <add>, %47, %cst_8 [2] : vector<8x8x8xf32> to vector<8x8xf32>
    %49 = vector.shape_cast %48 : vector<8x8xf32> to vector<8x8x1xf32>
    %50 = tpu.reciprocal %49 {approx = true} : vector<8x8x1xf32> -> vector<8x8x1xf32>
    %51 = arith.mulf %49, %50 : vector<8x8x1xf32>
    %cst_9 = arith.constant 2.000000e+00 : f32
    %52 = vector.broadcast %cst_9 : f32 to vector<8x8x1xf32>
    %53 = arith.subf %52, %51 : vector<8x8x1xf32>
    %54 = arith.mulf %50, %53 : vector<8x8x1xf32>
    %55 = vector.broadcast %54 : vector<8x8x1xf32> to vector<8x8x8xf32>
    %56 = arith.mulf %47, %55 : vector<8x8x8xf32>
    %57 = vector.shape_cast %56 : vector<8x8x8xf32> to vector<4x2x8x8xf32>
    %cst_10 = arith.constant dense<0.000000e+00> : vector<2x8x8xf32>
    %58 = vector.multi_reduction <add>, %57, %cst_10 [0] : vector<4x2x8x8xf32> to vector<2x8x8xf32>
    %cst_11 = arith.constant 2.500000e-01 : f32
    %59 = vector.broadcast %cst_11 : f32 to vector<2x8x8xf32>
    %60 = arith.mulf %58, %59 : vector<2x8x8xf32>
    %c0_12 = arith.constant 0 : index
    %c0_13 = arith.constant 0 : index
    %c0_14 = arith.constant 0 : index
    %61 = vector.load %arg14[%c0_12, %c0_13, %c0_14] : memref<2x8x8xf32, #tpu.memory_space<vmem>>, vector<2x8x8xf32>
    tpu.vector_store %arg14[%c0_12, %c0_13, %c0_14], %60 {strides = array<i32>} : memref<2x8x8xf32, #tpu.memory_space<vmem>>, vector<2x8x8xf32>,
    %62 = arith.truncf %56 : vector<8x8x8xf32> to vector<8x8x8xbf16>
    "tpu.trace_start"() <{level = 10 : i32, message = "gqk,gkd->gqd"}> : () -> ()
    %cst_15 = arith.constant dense<0.000000e+00> : vector<8x8x8xf32>
    %63 = tpu.matmul %62, %41, %cst_15 {dimension_numbers = #tpu.dot_dimension_numbers<[2], [1], [1], [2], [0, 0, 0, 1, 1, 2], [0], [0]>} : vector<8x8x8xbf16>, vector<8x8x8xbf16>, vector<8x8x8xf32> -> vector<8x8x8xf32>
    "tpu.trace_stop"() : () -> ()
    %64 = vector.extract_strided_slice %63 {offsets = [0, 0, 0], sizes = [2, 8, 8], strides = [1, 1, 1]} : vector<8x8x8xf32> to vector<2x8x8xf32>
    %65 = vector.shape_cast %64 : vector<2x8x8xf32> to vector<16x8xf32>
    %66 = vector.extract_strided_slice %63 {offsets = [2, 0, 0], sizes = [2, 8, 8], strides = [1, 1, 1]} : vector<8x8x8xf32> to vector<2x8x8xf32>
    %67 = vector.shape_cast %66 : vector<2x8x8xf32> to vector<16x8xf32>
    %68 = vector.extract_strided_slice %63 {offsets = [4, 0, 0], sizes = [2, 8, 8], strides = [1, 1, 1]} : vector<8x8x8xf32> to vector<2x8x8xf32>
    %69 = vector.shape_cast %68 : vector<2x8x8xf32> to vector<16x8xf32>
    %70 = vector.extract_strided_slice %63 {offsets = [6, 0, 0], sizes = [2, 8, 8], strides = [1, 1, 1]} : vector<8x8x8xf32> to vector<2x8x8xf32>
    %71 = vector.shape_cast %70 : vector<2x8x8xf32> to vector<16x8xf32>
    %72 = tpu.concatenate %65, %67, %69, %71 in 1 : vector<16x8xf32>, vector<16x8xf32>, vector<16x8xf32>, vector<16x8xf32> -> vector<16x32xf32>
    %73 = arith.truncf %72 : vector<16x32xf32> to vector<16x32xbf16>
    %c0_16 = arith.constant 0 : index
    %c0_17 = arith.constant 0 : index
    %74 = vector.load %arg3[%c0_16, %c0_17] : memref<32x32xbf16, #tpu.memory_space<vmem>>, vector<32x32xbf16>
    %cst_18 = arith.constant dense<0.000000e+00> : vector<16x32xf32>
    %75 = tpu.matmul %73, %74, %cst_18 {dimension_numbers = #tpu.dot_dimension_numbers<[1], [0], [0], [1], [0, 0, 1, 1], [], []>} : vector<16x32xbf16>, vector<32x32xbf16>, vector<16x32xf32> -> vector<16x32xf32>
    %c0_19 = arith.constant 0 : index
    %c0_20 = arith.constant 0 : index
    %76 = vector.load %arg4[%c0_19, %c0_20] : memref<1x32xf32, #tpu.memory_space<vmem>>, vector<1x32xf32>
    %77 = vector.broadcast %76 : vector<1x32xf32> to vector<16x32xf32>
    %78 = arith.addf %75, %77 : vector<16x32xf32>
    %79 = arith.addf %2, %78 : vector<16x32xf32>
    %c0_21 = arith.constant 0 : index
    %c0_22 = arith.constant 0 : index
    %80 = vector.load %arg9[%c0_21, %c0_22] : memref<1x32xf32, #tpu.memory_space<vmem>>, vector<1x32xf32>
    %c0_23 = arith.constant 0 : index
    %c0_24 = arith.constant 0 : index
    %81 = vector.load %arg10[%c0_23, %c0_24] : memref<1x32xf32, #tpu.memory_space<vmem>>, vector<1x32xf32>
    %cst_25 = arith.constant dense<0.000000e+00> : vector<16xf32>
    %82 = vector.multi_reduction <add>, %79, %cst_25 [1] : vector<16x32xf32> to vector<16xf32>
    %83 = vector.shape_cast %82 : vector<16xf32> to vector<16x1xf32>
    %cst_26 = arith.constant 3.200000e+01 : f32
    %84 = vector.broadcast %cst_26 : f32 to vector<16x1xf32>
    %85 = arith.divf %83, %84 : vector<16x1xf32>
    %86 = vector.broadcast %85 : vector<16x1xf32> to vector<16x32xf32>
    %87 = arith.subf %79, %86 : vector<16x32xf32>
    %88 = arith.mulf %87, %87 : vector<16x32xf32>
    %cst_27 = arith.constant dense<0.000000e+00> : vector<16xf32>
    %89 = vector.multi_reduction <add>, %88, %cst_27 [1] : vector<16x32xf32> to vector<16xf32>
    %90 = vector.shape_cast %89 : vector<16xf32> to vector<16x1xf32>
    %cst_28 = arith.constant 3.200000e+01 : f32
    %91 = vector.broadcast %cst_28 : f32 to vector<16x1xf32>
    %92 = arith.divf %90, %91 : vector<16x1xf32>
    %93 = vector.broadcast %85 : vector<16x1xf32> to vector<16x32xf32>
    %94 = arith.subf %79, %93 : vector<16x32xf32>
    %cst_29 = arith.constant 9.99999974E-6 : f32
    %95 = vector.broadcast %cst_29 : f32 to vector<16x1xf32>
    %96 = arith.addf %92, %95 : vector<16x1xf32>
    %97 = math.rsqrt %96 : vector<16x1xf32>
    %98 = vector.broadcast %97 : vector<16x1xf32> to vector<16x32xf32>
    %99 = arith.mulf %94, %98 : vector<16x32xf32>
    %100 = vector.broadcast %80 : vector<1x32xf32> to vector<16x32xf32>
    %101 = arith.mulf %99, %100 : vector<16x32xf32>
    %102 = vector.broadcast %81 : vector<1x32xf32> to vector<16x32xf32>
    %103 = arith.addf %101, %102 : vector<16x32xf32>
    %104 = arith.truncf %103 : vector<16x32xf32> to vector<16x32xbf16>
    %c0_30 = arith.constant 0 : index
    %c0_31 = arith.constant 0 : index
    %105 = vector.load %arg5[%c0_30, %c0_31] : memref<32x64xbf16, #tpu.memory_space<vmem>>, vector<32x64xbf16>
    %cst_32 = arith.constant dense<0.000000e+00> : vector<16x64xf32>
    %106 = tpu.matmul %104, %105, %cst_32 {dimension_numbers = #tpu.dot_dimension_numbers<[1], [0], [0], [1], [0, 0, 1, 1], [], []>} : vector<16x32xbf16>, vector<32x64xbf16>, vector<16x64xf32> -> vector<16x64xf32>
    %c0_33 = arith.constant 0 : index
    %c0_34 = arith.constant 0 : index
    %107 = vector.load %arg6[%c0_33, %c0_34] : memref<1x64xf32, #tpu.memory_space<vmem>>, vector<1x64xf32>
    %108 = vector.broadcast %107 : vector<1x64xf32> to vector<16x64xf32>
    %109 = arith.addf %106, %108 : vector<16x64xf32>
    %cst_35 = arith.constant 0.000000e+00 : f32
    %110 = vector.broadcast %cst_35 : f32 to vector<16x64xf32>
    %111 = arith.maximumf %109, %110 : vector<16x64xf32>
    %112 = arith.truncf %111 : vector<16x64xf32> to vector<16x64xbf16>
    %c0_36 = arith.constant 0 : index
    %c0_37 = arith.constant 0 : index
    %113 = vector.load %arg7[%c0_36, %c0_37] : memref<64x32xbf16, #tpu.memory_space<vmem>>, vector<64x32xbf16>
    %cst_38 = arith.constant dense<0.000000e+00> : vector<16x32xf32>
    %114 = tpu.matmul %112, %113, %cst_38 {dimension_numbers = #tpu.dot_dimension_numbers<[1], [0], [0], [1], [0, 0, 1, 1], [], []>} : vector<16x64xbf16>, vector<64x32xbf16>, vector<16x32xf32> -> vector<16x32xf32>
    %c0_39 = arith.constant 0 : index
    %c0_40 = arith.constant 0 : index
    %115 = vector.load %arg8[%c0_39, %c0_40] : memref<1x32xf32, #tpu.memory_space<vmem>>, vector<1x32xf32>
    %116 = vector.broadcast %115 : vector<1x32xf32> to vector<16x32xf32>
    %117 = arith.addf %114, %116 : vector<16x32xf32>
    %118 = arith.addf %103, %117 : vector<16x32xf32>
    %c0_41 = arith.constant 0 : index
    %c0_42 = arith.constant 0 : index
    %119 = vector.load %arg11[%c0_41, %c0_42] : memref<1x32xf32, #tpu.memory_space<vmem>>, vector<1x32xf32>
    %c0_43 = arith.constant 0 : index
    %c0_44 = arith.constant 0 : index
    %120 = vector.load %arg12[%c0_43, %c0_44] : memref<1x32xf32, #tpu.memory_space<vmem>>, vector<1x32xf32>
    %cst_45 = arith.constant dense<0.000000e+00> : vector<16xf32>
    %121 = vector.multi_reduction <add>, %118, %cst_45 [1] : vector<16x32xf32> to vector<16xf32>
    %122 = vector.shape_cast %121 : vector<16xf32> to vector<16x1xf32>
    %cst_46 = arith.constant 3.200000e+01 : f32
    %123 = vector.broadcast %cst_46 : f32 to vector<16x1xf32>
    %124 = arith.divf %122, %123 : vector<16x1xf32>
    %125 = vector.broadcast %124 : vector<16x1xf32> to vector<16x32xf32>
    %126 = arith.subf %118, %125 : vector<16x32xf32>
    %127 = arith.mulf %126, %126 : vector<16x32xf32>
    %cst_47 = arith.constant dense<0.000000e+00> : vector<16xf32>
    %128 = vector.multi_reduction <add>, %127, %cst_47 [1] : vector<16x32xf32> to vector<16xf32>
    %129 = vector.shape_cast %128 : vector<16xf32> to vector<16x1xf32>
    %cst_48 = arith.constant 3.200000e+01 : f32
    %130 = vector.broadcast %cst_48 : f32 to vector<16x1xf32>
    %131 = arith.divf %129, %130 : vector<16x1xf32>
    %132 = vector.broadcast %124 : vector<16x1xf32> to vector<16x32xf32>
    %133 = arith.subf %118, %132 : vector<16x32xf32>
    %cst_49 = arith.constant 9.99999974E-6 : f32
    %134 = vector.broadcast %cst_49 : f32 to vector<16x1xf32>
    %135 = arith.addf %131, %134 : vector<16x1xf32>
    %136 = math.rsqrt %135 : vector<16x1xf32>
    %137 = vector.broadcast %136 : vector<16x1xf32> to vector<16x32xf32>
    %138 = arith.mulf %133, %137 : vector<16x32xf32>
    %139 = vector.broadcast %119 : vector<1x32xf32> to vector<16x32xf32>
    %140 = arith.mulf %138, %139 : vector<16x32xf32>
    %141 = vector.broadcast %120 : vector<1x32xf32> to vector<16x32xf32>
    %142 = arith.addf %140, %141 : vector<16x32xf32>
    %143 = vector.shape_cast %142 : vector<16x32xf32> to vector<2x8x32xf32>
    %144 = tpu.transpose %143, [1, 0, 2] : vector<2x8x32xf32> -> vector<8x2x32xf32>
    %c0_50 = arith.constant 0 : index
    %c0_51 = arith.constant 0 : index
    %c0_52 = arith.constant 0 : index
    %145 = vector.load %arg13[%c0_50, %c0_51, %c0_52] : memref<8x2x32xf32, #tpu.memory_space<vmem>>, vector<8x2x32xf32>
    tpu.vector_store %arg13[%c0_50, %c0_51, %c0_52], %144 {strides = array<i32>} : memref<8x2x32xf32, #tpu.memory_space<vmem>>, vector<8x2x32xf32>,
    return
  }
}

</mosaic_0001>

<bundles_post_ra>
// kernel: transformer_encoder_layer.1
= control target key start
LH: loop header
LB: loop body
LE: loop exit
PB: predicated region body
PF: predicated region fallthrough
CT: control target
= control target key end

     0   :  { %20 = vsyncpa [#allocation3], 0  ;;  %s1866_s0 = inlined_call_operand.vmem [shape: f32[8,2,32], index: 0, kind: input, shape index: {}]   ;;  %s1867_s1 = inlined_call_operand.vmem [shape: bf16[32,96], index: 1, kind: input, shape index: {}]   ;;  %s1868_s2 = inlined_call_operand.vmem [shape: f32[1,96], index: 2, kind: input, shape index: {}]   ;;  %s1869_s3 = inlined_call_operand.vmem [shape: bf16[32,32], index: 3, kind: input, shape index: {}]   ;;  %s1870_s4 = inlined_call_operand.vmem [shape: f32[1,32], index: 4, kind: input, shape index: {}]   ;;  %s1871_s5 = inlined_call_operand.hbm [shape: bf16[32,64], index: 5, kind: input, shape index: {}]   ;;  %s1872_s6 = inlined_call_operand.hbm [shape: f32[1,64], index: 6, kind: input, shape index: {}]   ;;  %s1873_s7 = inlined_call_operand.vmem [shape: bf16[64,32], index: 7, kind: input, shape index: {}]   ;;  %s1874_s8 = inlined_call_operand.hbm [shape: f32[1,32], index: 8, kind: input, shape index: {}]   ;;  %s1875_s9 = inlined_call_operand.vmem [shape: f32[1,32], index: 9, kind: input, shape index: {}]   ;;  %s1876_s10 = inlined_call_operand.hbm [shape: f32[1,32], index: 10, kind: input, shape index: {}]   ;;  %s1877_s11 = inlined_call_operand.vmem [shape: f32[1,32], index: 11, kind: input, shape index: {}]   ;;  %s1878_s12 = inlined_call_operand.hbm [shape: f32[1,32], index: 12, kind: input, shape index: {}]   ;;  %s1879_s13 = inlined_call_operand.hbm [shape: f32[8,2,32], index: 13, kind: output, shape index: {0}]   ;;  %s1880_s14 = inlined_call_operand.hbm [shape: f32[2,8,8], index: 14, kind: output, shape index: {1}]  }
   0x1   :  { %21 = vsyncpa [#allocation6], 0 }
   0x2   :  { %22 = vsyncpa [#allocation9], 0 }
   0x3   :  { %23 = vsyncpa [#allocation4], 0  ;;  %s53_s15 = sshll.u32 %s1872_s6, 4  ;;  %s54_s15 = int_to_ptr.hbm [resolvable:$true] %s53_s15 }
   0x4   :  { %24 = vsyncpa [#allocation13], 0  ;;  %s1458_s16 = smov [#allocation5]   ;;  %s79_s20 = sshll.u32 %s1876_s10, 4  ;;  %s80_s20 = int_to_ptr.hbm [resolvable:$true] %s79_s20 }
   0x5   :  { %s55_s17 = sshll.u32 %s1458_s16, 4  ;;  %s1459_s21 = smov [#allocation8]   ;;  %s56_s17 = int_to_ptr.vmem [resolvable:$true] %s55_s17 }
   0x6   :  { %58 = dma.hbm_to_vmem [thread:$0]  %s54_s15, 16, %s56_s17, [#allocation6]  }
   0x7   :  { %s81_s22 = sshll.u32 %s1459_s21, 4  ;;  %s39_s25 = sshll.u32 %s1871_s5, 4  ;;  %s82_s22 = int_to_ptr.vmem [resolvable:$true] %s81_s22  ;;  %s40_s25 = int_to_ptr.hbm [resolvable:$true] %s39_s25 }
   0x8   :  { %84 = dma.hbm_to_vmem [thread:$0]  %s80_s20, 16, %s82_s22, [#allocation9]  }
   0x9   :  { %s1460_s6 = smov [#allocation2]   ;;  %s66_s29 = sshll.u32 %s1874_s8, 4  ;;  %s67_s29 = int_to_ptr.hbm [resolvable:$true] %s66_s29 }
   0xa   :  { %s41_s26 = sshll.u32 %s1460_s6, 4  ;;  %s1461_s30 = smov 64   ;;  %s42_s26 = int_to_ptr.vmem [resolvable:$true] %s41_s26 }
   0xb   :  { %s1462_s10 = smov 4   ;;  %s1463_s15 = smov [#allocation7]  }
   0xc   :  { %47 = dma.hbm_to_vmem [thread:$0]  %s40_s25, 256, %s42_s26, [#allocation3], %s1461_s30, %s1461_s30, %s1462_s10  }
   0xd   :  { %s68_s16 = sshll.u32 %s1463_s15, 4  ;;  %s92_s18 = sshll.u32 %s1878_s12, 4  ;;  %s69_s16 = int_to_ptr.vmem [resolvable:$true] %s68_s16  ;;  %s93_s18 = int_to_ptr.hbm [resolvable:$true] %s92_s18 }
   0xe   :  { %71 = dma.hbm_to_vmem [thread:$0]  %s67_s29, 16, %s69_s16, [#allocation6]  }
   0xf   :  { %s1464_s19 = smov [#allocation10]  }
  0x10   :  { %s94_s20 = sshll.u32 %s1464_s19, 4  ;;  %s95_s20 = int_to_ptr.vmem [resolvable:$true] %s94_s20 }
  0x11   :  { %97 = dma.hbm_to_vmem [thread:$0]  %s93_s18, 16, %s95_s20, [#allocation9]  }
  0x12   :  { %1448 = dma.done.wait [#allocation3], 256  }
  0x13   :  { %1449 = vsyncadd [#allocation3], 4294967040 }
  0x14   :  { %1450 = dma.done.wait [#allocation6], 32  }
  0x15   :  { %1451 = vsyncadd [#allocation6], 4294967264 }
  0x16   :  { %1452 = dma.done.wait [#allocation9], 32  }
  0x17   :  { %1453 = vsyncadd [#allocation9], 4294967264  ;;  %v1465_v0 = vmov 1983009808   ;;  %vm128_vm0 = vcmask 1047556   ;;  %v1184_v2 = vld [vmem:[%s1867_s1 + $0x8] sm:$0xff] }
  0x18   :  { %v131_v1 = vunpack.c.l.s4 %v1465_v0  ;;  %v1183_v3 = vld [vmem:[%s1867_s1] sm:$0xff]  ;;  %199 = vmatpush.bf16.msra.mxu0 %v1184_v2  ;;  %v123_v8 = vld [vmem:[%s1866_s0 + $0x8] sm:$0x3]  ;;  %v124_v9 = vld [vmem:[%s1866_s0 + $0xa] sm:$0x3]  ;;  %vm189_vm1 = vcmask 261120  }
  0x19   :  { %v119_v4 = vld [vmem:[%s1866_s0] sm:$0x3]  ;;  %v120_v5 = vld [vmem:[%s1866_s0 + $0x2] sm:$0x3]  ;;  %v121_v6 = vld [vmem:[%s1866_s0 + $0x4] sm:$0x3] }
  0x1a   :  { %v122_v7 = vld [vmem:[%s1866_s0 + $0x6] sm:$0x3]  ;;  %v125_v10 = vld [vmem:[%s1866_s0 + $0xc] sm:$0x3]  ;;  %v1599_v11 = vunpack.c.0.s8 %v131_v1  ;;  %v126_v12 = vld [vmem:[%s1866_s0 + $0xe] sm:$0x3] }
  0x1b   :  { %v127_v13 = vrot.slane %v121_v6, 4  ;;  %v134_v14 = vrot.slane %v122_v7, 4  ;;  %v140_v15 = vrot.slane %v125_v10, 4  ;;  %v1466_v16 = vmov 1934713408   ;;  %s1467_s8 = smov 112  }
  0x1c   :  { %v155_v17 = vunpack.c.l.s4 %v1466_v16  ;;  %v146_v18 = vrot.slane %v126_v12, 4  ;;  %200 = vmatpush.bf16.msra.mxu0 %v1183_v3  ;;  %v1230_v39 = vld [vmem:[%s1868_s2] ss:$0 sm:$0xff]  ;;  %s1468_s21 = smov 120   ;;  %s1469_s12 = smov 104   ;;  %vm240_vm2 = vcmask 64512  }
  0x1d   :  { %v129_v19 = vsel %vm128_vm0, %v127_v13, %v119_v4  ;;  %v135_v20 = vsel %vm128_vm0, %v134_v14, %v120_v5  ;;  %v141_v21 = vsel %vm128_vm0, %v140_v15, %v123_v8  ;;  %s1470_s2 = smov 96   ;;  %vm571_vm3 = vcmask 1043456   ;;  %s1472_s22 = smov 16  }
  0x1e   :  { %v133_v22 = vperm.slane %v129_v19, %v1599_v11  ;;  %v139_v23 = vperm.slane %v135_v20, %v1599_v11  ;;  %v147_v24 = vsel %vm128_vm0, %v146_v18, %v124_v9  ;;  %v145_v25 = vperm.slane %v141_v21, %v1599_v11  ;;  %s1473_s23 = smov 24   ;;  %s1103_s20 = sshll.u32 %s1880_s14, 4  ;;  %s1104_s20 = int_to_ptr.hbm [resolvable:$true] %s1103_s20 }
  0x1f   :  { %v151_v26 = vperm.slane %v147_v24, %v1599_v11  ;;  %v1612_v27 = vunpack.c.0.s8 %v155_v17  ;;  %vm761_vm4 = vcmask 130048   ;;  %vm764_vm5 = vcmask 195584  }
  0x20   :  { %v152_v28 = vrot.slane %v139_v23, 4  ;;  %vm947_vm13 = vcmask 523264  }
  0x21   :  { %v158_v29 = vrot.slane %v151_v26, 4 }
  0x22   :  { %v153_v30 = vsel %vm128_vm0, %v152_v28, %v133_v22 }
  0x23   :  { %v157_v31 = vperm.slane %v153_v30, %v1612_v27  ;;  %v159_v32 = vsel %vm128_vm0, %v158_v29, %v145_v25 }
  0x24   :  { %v163_v33 = vperm.slane %v159_v32, %v1612_v27 }
  0x25   :  { %v166_v34 = vrot.slane %v157_v31, 4 }
  0x26   :  { %v164_v35 = vrot.slane %v163_v33, 4 }
  0x27   :  { %v1619_v36 = vsel %vm128_vm0, %v163_v33, %v166_v34 }
  0x28   :  { %v1622_v37 = vsel %vm128_vm0, %v164_v35, %v157_v31 }
  0x29   :  { %v168_v38 = vpack.c.bf16 %v1619_v36, %v1622_v37 }
  0x2b   :  { %1131 = vmatmul.msk.bf16.vlgmr.msra.gmra.mxu0 %vm189_vm1, %v168_v38 }
  0xa8   :  { %v202_v40 = vpop.f32.mrf.mxu0 }
  0xa9   :  { %v203_v41 = vadd.f32 %v1230_v39, %v202_v40 }
  0xab   :  { %215 = vrot.lane.b32.xlu2 %v203_v41, %s1467_s8  ;;  %209 = vrot.lane.b32.xlu0 %v203_v41, %s1468_s21  ;;  %v227_v44 = vpack.c.bf16 %v203_v41, %v203_v41 }
  0xad   :  { %v236_v46 = vunpack.c.l.b16 %v227_v44 }
  0xaf   :  { %v1630_v48 = vpack.c.b16 %v236_v46, %v236_v46 }
  0xb0   :  { %v204_v42 = vpop.f32.mrf.mxu0 }
  0xb1   :  { %v205_v43 = vadd.f32 %v1230_v39, %v204_v42 }
  0xb3   :  { %217 = vrot.lane.b32.xlu1 %v205_v43, %s1467_s8  ;;  %223 = vrot.lane.b32.xlu2 %v205_v43, %s1469_s12  ;;  %v228_v45 = vpack.c.bf16 %v205_v43, %v205_v43  ;;  %s1476_s8 = smov 128  }
  0xb4   :  { %211 = vrot.lane.b32.xlu0 %v205_v43, %s1468_s21 }
  0xb5   :  { %v261_v47 = vunpack.c.l.b16 %v228_v45 }
  0xb7   :  { %v262_v49 = vpack.c.b16 %v261_v47, %v261_v47 }
  0xbb   :  { %221 = vrot.lane.b32.xlu1 %v203_v41, %s1469_s12  ;;  %238 = vrot.lane.b32.xlu2 %v1630_v48, %s1470_s2 }
  0xbc   :  { %263 = vrot.lane.b32.xlu0 %v262_v49, %s1470_s2 }
 0x105   :  { %v216_v50 = vpop.permute.xlu2 %215 }
 0x106   :  { %v231_v2 = vpack.c.bf16 %v216_v50, %v216_v50 }
 0x108   :  { %v333_v8 = vunpack.c.l.b16 %v231_v2 }
 0x10a   :  { %v1654_v14 = vpack.c.b16 %v333_v8, %v333_v8 }
 0x10d   :  { %v224_v51 = vpop.permute.xlu2 %223 }
 0x10e   :  { %v234_v0 = vpack.c.bf16 %v224_v51, %v224_v51 }
 0x110   :  { %v405_v5 = vunpack.c.l.b16 %v234_v0 }
 0x112   :  { %v1650_v12 = vpack.c.b16 %v405_v5, %v405_v5 }
 0x115   :  { %v239_v52 = vpop.permute.xlu2 %238 }
 0x116   :  { %v245_v53 = vsel %vm240_vm2, %v239_v52, 0 }
 0x117   :  { %254 = vmatpush.bf16.xpose.msra.mxu1 %v245_v53 }
 0x11d   :  { %v210_v54 = vpop.permute.xlu0 %209 }
 0x11e   :  { %v229_v55 = vpack.c.bf16 %v210_v54, %v210_v54  ;;  %1132 = vmatmul.msk.bf16.vlgmr.msra.gmra.mxu1 %vm240_vm2, %v227_v44 }
 0x120   :  { %v285_v56 = vunpack.c.l.b16 %v229_v55 }
 0x122   :  { %v1637_v57 = vpack.c.b16 %v285_v56, %v285_v56 }
 0x124   :  { %287 = vrot.lane.b32.xlu1 %v1637_v57, %s1470_s2 }
 0x125   :  { %v218_v58 = vpop.permute.xlu1 %217 }
 0x126   :  { %v232_v59 = vpack.c.bf16 %v218_v58, %v218_v58  ;;  %v212_v60 = vpop.permute.xlu0 %211 }
 0x127   :  { %v230_v61 = vpack.c.bf16 %v212_v60, %v212_v60 }
 0x128   :  { %v357_v62 = vunpack.c.l.b16 %v232_v59 }
 0x129   :  { %v309_v63 = vunpack.c.l.b16 %v230_v61 }
 0x12a   :  { %v1641_v1 = vpack.c.b16 %v357_v62, %v357_v62 }
 0x12b   :  { %v1643_v3 = vpack.c.b16 %v309_v63, %v309_v63 }
 0x12c   :  { %359 = vrot.lane.b32.xlu1 %v1641_v1, %s1470_s2 }
 0x12d   :  { %311 = vrot.lane.b32.xlu0 %v1643_v3, %s1470_s2  ;;  %v222_v4 = vpop.permute.xlu1 %221 }
 0x12e   :  { %v233_v6 = vpack.c.bf16 %v222_v4, %v222_v4  ;;  %v264_v7 = vpop.permute.xlu0 %263 }
 0x12f   :  { %v269_v9 = vsel %vm240_vm2, %v264_v7, 0 }
 0x130   :  { %v381_v10 = vunpack.c.l.b16 %v233_v6  ;;  %278 = vmatpush.bf16.xpose.msra.mxu2 %v269_v9 }
 0x132   :  { %v1652_v13 = vpack.c.b16 %v381_v10, %v381_v10 }
 0x134   :  { %407 = vrot.lane.b32.xlu1 %v1650_v12, %s1470_s2  ;;  %383 = vrot.lane.b32.xlu2 %v1652_v13, %s1470_s2 }
 0x135   :  { %335 = vrot.lane.b32.xlu0 %v1654_v14, %s1470_s2 }
 0x137   :  { %1133 = vmatmul.msk.bf16.vlgmr.msra.gmra.mxu2 %vm240_vm2, %v228_v45 }
 0x13c   :  { %588 = vrot.lane.b32.xlu1 %v262_v49, %s1461_s30 }
 0x18e   :  { %v384_v15 = vpop.permute.xlu2 %383 }
 0x18f   :  { %v389_v18 = vsel %vm240_vm2, %v384_v15, 0 }
 0x196   :  { %v288_v16 = vpop.permute.xlu1 %287 }
 0x197   :  { %v293_v17 = vsel %vm240_vm2, %v288_v16, 0 }
 0x198   :  { %302 = vmatpush.bf16.xpose.msra.mxu3 %v293_v17 }
 0x19b   :  { %v256_v19 = vpop.f32.mrf.mxu1 }
 0x19c   :  { %v428_v20 = vsel %vm240_vm2, %v256_v19, -inf }
 0x19d   :  { %429 = vmax.xlane.f32.xlu1 %v428_v20 }
 0x19e   :  { %v360_v21 = vpop.permute.xlu1 %359 }
 0x19f   :  { %v312_v22 = vpop.permute.xlu0 %311  ;;  %1134 = vmatmul.msk.bf16.vlgmr.msra.gmra.mxu3 %vm240_vm2, %v229_v55  ;;  %v365_v23 = vsel %vm240_vm2, %v360_v21, 0 }
 0x1a0   :  { %398 = vmatpush.bf16.xpose.msrb.mxu3 %v389_v18  ;;  %v317_v24 = vsel %vm240_vm2, %v312_v22, 0  ;;  %374 = vmatpush.bf16.xpose.msrb.mxu2 %v365_v23 }
 0x1a1   :  { %326 = vmatpush.bf16.xpose.msrb.mxu0 %v317_v24 }
 0x1a3   :  { %v258_v25 = vpop.f32.mrf.mxu1 }
 0x1a6   :  { %v408_v26 = vpop.permute.xlu1 %407 }
 0x1a7   :  { %v413_v28 = vsel %vm240_vm2, %v408_v26, 0  ;;  %v336_v29 = vpop.permute.xlu0 %335  ;;  %1137 = vmatmul.msk.bf16.vlgmr.msrb.gmra.mxu2 %vm240_vm2, %v232_v59 }
 0x1a8   :  { %1135 = vmatmul.msk.bf16.vlgmr.msrb.gmra.mxu0 %vm240_vm2, %v230_v61  ;;  %v341_v30 = vsel %vm240_vm2, %v336_v29, 0 }
 0x1a9   :  { %350 = vmatpush.bf16.xpose.msrb.mxu1 %v341_v30  ;;  %422 = vmatpush.bf16.xpose.msra.mxu0 %v413_v28 }
 0x1ae   :  { %v589_v31 = vpop.permute.xlu1 %588 }
 0x1af   :  { %v594_v32 = vsel %vm571_vm3, %v589_v31, 0  ;;  %1138 = vmatmul.msk.bf16.vlgmr.msrb.gmra.mxu3 %vm240_vm2, %v233_v6 }
 0x1b0   :  { %1136 = vmatmul.msk.bf16.vlgmr.msrb.gmra.mxu1 %vm240_vm2, %v231_v2  ;;  %603 = vmatpush.bf16.msra.mxu2 %v594_v32 }
 0x1b8   :  { %1139 = vmatmul.msk.bf16.vlgmr.msra.gmra.mxu0 %vm240_vm2, %v234_v0 }
 0x1ba   :  { %v280_v33 = vpop.f32.mrf.mxu2 }
 0x1bb   :  { %v431_v34 = vsel %vm240_vm2, %v280_v33, -inf }
 0x1bc   :  { %432 = vmax.xlane.f32.xlu2 %v431_v34 }
 0x1c2   :  { %v282_v35 = vpop.f32.mrf.mxu2 }
 0x210   :  { %v430_v38 = vpop.xlane.xlu1 %429 }
 0x211   :  { %v452_v39 = vsub.f32 %v256_v19, %v430_v38 }
 0x213   :  { %v460_v40 = vmul.f32 1.442695, %v452_v39 }
 0x215   :  { %1238 = vpow2.f32 %v460_v40 }
 0x21b   :  { %v1681_v47 = vpop.eup %1238 }
 0x21c   :  { %v476_v51 = vsel %vm240_vm2, %v1681_v47, 0.0 }
 0x222   :  { %v304_v41 = vpop.f32.mrf.mxu3 }
 0x223   :  { %v434_v42 = vsel %vm240_vm2, %v304_v41, -inf }
 0x224   :  { %435 = vmax.xlane.f32.xlu0 %v434_v42 }
 0x225   :  { %v328_v43 = vpop.f32.mrf.mxu0 }
 0x226   :  { %v437_v44 = vsel %vm240_vm2, %v328_v43, -inf }
 0x227   :  { %438 = vmax.xlane.f32.xlu2 %v437_v44 }
 0x22a   :  { %v306_v45 = vpop.f32.mrf.mxu3  ;;  %v376_v46 = vpop.f32.mrf.mxu2 }
 0x22b   :  { %v443_v59 = vsel %vm240_vm2, %v376_v46, -inf }
 0x22d   :  { %v330_v49 = vpop.f32.mrf.mxu0  ;;  %v352_v50 = vpop.f32.mrf.mxu1 }
 0x22e   :  { %v440_v52 = vsel %vm240_vm2, %v352_v50, -inf }
 0x22f   :  { %477 = vadd.xlane.f32.xlu2 %v476_v51  ;;  %441 = vmax.xlane.f32.xlu1 %v440_v52  ;;  %v433_v63 = vpop.xlane.xlu2 %432 }
 0x230   :  { %v453_v0 = vsub.f32 %v280_v33, %v433_v63 }
 0x232   :  { %v378_v53 = vpop.f32.mrf.mxu2  ;;  %v400_v54 = vpop.f32.mrf.mxu3  ;;  %v462_v2 = vmul.f32 1.442695, %v453_v0 }
 0x233   :  { %v446_v55 = vsel %vm240_vm2, %v400_v54, -inf }
 0x234   :  { %447 = vmax.xlane.f32.xlu0 %v446_v55  ;;  %1240 = vpow2.f32 %v462_v2 }
 0x235   :  { %v354_v56 = vpop.f32.mrf.mxu1  ;;  %v1687_v58 = vpop.f32.mrf.mxu0 }
 0x236   :  { %v449_v62 = vsel %vm240_vm2, %v1687_v58, -inf }
 0x237   :  { %444 = vmax.xlane.f32.xlu2 %v443_v59 }
 0x23a   :  { %v402_v60 = vpop.f32.mrf.mxu3  ;;  %v1696_v4 = vpop.eup %1240 }
 0x23b   :  { %v479_v5 = vsel %vm240_vm2, %v1696_v4, 0.0 }
 0x23d   :  { %v426_v61 = vpop.f32.mrf.mxu0 }
 0x23f   :  { %450 = vmax.xlane.f32.xlu2 %v449_v62 }
 0x248   :  { %566 = vrot.lane.b32.xlu0 %v1630_v48, %s1461_s30 }
 0x257   :  { %609 = vrot.lane.b32.xlu2 %v1637_v57, %s1461_s30 }
 0x272   :  { %480 = vadd.xlane.f32.xlu0 %v479_v5 }
 0x297   :  { %v436_v6 = vpop.xlane.xlu0 %435 }
 0x298   :  { %v454_v7 = vsub.f32 %v304_v41, %v436_v6 }
 0x29a   :  { %v464_v8 = vmul.f32 1.442695, %v454_v7  ;;  %v439_v9 = vpop.xlane.xlu2 %438 }
 0x29b   :  { %v455_v10 = vsub.f32 %v328_v43, %v439_v9 }
 0x29c   :  { %1242 = vpow2.f32 %v464_v8 }
 0x29d   :  { %v466_v48 = vmul.f32 1.442695, %v455_v10 }
 0x29f   :  { %1244 = vpow2.f32 %v466_v48 }
 0x2a2   :  { %v1700_v15 = vpop.eup %1242  ;;  %v442_v57 = vpop.xlane.xlu1 %441 }
 0x2a3   :  { %v478_v16 = vpop.xlane.xlu2 %477  ;;  %v456_v17 = vsub.f32 %v352_v50, %v442_v57  ;;  %v482_v18 = vsel %vm240_vm2, %v1700_v15, 0.0 }
 0x2a4   :  { %1246 = vrcp.f32 %v478_v16  ;;  %483 = vadd.xlane.f32.xlu1 %v482_v18 }
 0x2a5   :  { %v1704_v19 = vpop.eup %1244  ;;  %v468_v20 = vmul.f32 1.442695, %v456_v17 }
 0x2a6   :  { %v485_v21 = vsel %vm240_vm2, %v1704_v19, 0.0 }
 0x2a7   :  { %1248 = vpow2.f32 %v468_v20  ;;  %486 = vadd.xlane.f32.xlu0 %v485_v21  ;;  %v448_v23 = vpop.xlane.xlu0 %447 }
 0x2a8   :  { %v458_v29 = vsub.f32 %v400_v54, %v448_v23 }
 0x2aa   :  { %v1247_v22 = vpop.eup %1246  ;;  %v472_v33 = vmul.f32 1.442695, %v458_v29 }
 0x2ab   :  { %v445_v24 = vpop.xlane.xlu2 %444  ;;  %v508_v28 = vmul.f32 %v1247_v22, %v478_v16 }
 0x2ac   :  { %v457_v25 = vsub.f32 %v376_v46, %v445_v24 }
 0x2ad   :  { %v1708_v26 = vpop.eup %1248  ;;  %v516_v32 = vsub.f32 2.0, %v508_v28 }
 0x2ae   :  { %v470_v30 = vmul.f32 1.442695, %v457_v25  ;;  %v488_v31 = vsel %vm240_vm2, %v1708_v26, 0.0 }
 0x2af   :  { %489 = vadd.xlane.f32.xlu2 %v488_v31  ;;  %v524_v38 = vmul.f32 %v1247_v22, %v516_v32 }
 0x2b0   :  { %1250 = vpow2.f32 %v470_v30 }
 0x2b1   :  { %1252 = vpow2.f32 %v472_v33  ;;  %v1717_v40 = vmul.f32 %v1681_v47, %v524_v38 }
 0x2b3   :  { %v451_v34 = vpop.xlane.xlu2 %450  ;;  %v558_v46 = vpack.c.bf16 %v1717_v40, %v1717_v40  ;;  %v540_v30 = vsel %vm240_vm2, %v1717_v40, 0.0 }
 0x2b4   :  { %v459_v49 = vsub.f32 %v1687_v58, %v451_v34 }
 0x2b6   :  { %v1712_v35 = vpop.eup %1250  ;;  %v474_v50 = vmul.f32 1.442695, %v459_v49 }
 0x2b7   :  { %v491_v39 = vsel %vm240_vm2, %v1712_v35, 0.0  ;;  %v1719_v43 = vpop.eup %1252 }
 0x2b8   :  { %492 = vadd.xlane.f32.xlu0 %v491_v39  ;;  %v494_v47 = vsel %vm240_vm2, %v1719_v43, 0.0  ;;  %1254 = vpow2.f32 %v474_v50 }
 0x2ba   :  { %v567_v42 = vpop.permute.xlu0 %566 }
 0x2bb   :  { %v610_v41 = vpop.permute.xlu2 %609  ;;  %v573_v45 = vsel %vm571_vm3, %v567_v42, 0 }
 0x2bc   :  { %v615_v44 = vsel %vm571_vm3, %v610_v41, 0  ;;  %582 = vmatpush.bf16.msra.mxu1 %v573_v45 }
 0x2bd   :  { %624 = vmatpush.bf16.msra.mxu3 %v615_v44  ;;  %630 = vrot.lane.b32.xlu1 %v1643_v3, %s1461_s30 }
 0x2be   :  { %v1735_v51 = vpop.eup %1254 }
 0x2bf   :  { %1140 = vmatmul.msk.bf16.vlgmr.msra.gmra.mxu1 %vm240_vm2, %v558_v46  ;;  %v497_v52 = vsel %vm240_vm2, %v1735_v51, 0.0 }
 0x2c0   :  { %495 = vadd.xlane.f32.xlu0 %v494_v47 }
 0x2d4   :  { %672 = vrot.lane.b32.xlu0 %v1641_v1, %s1461_s30 }
 0x2dc   :  { %693 = vrot.lane.b32.xlu0 %v1652_v13, %s1461_s30 }
 0x2e4   :  { %651 = vrot.lane.b32.xlu0 %v1654_v14, %s1461_s30 }
 0x2e5   :  { %v481_v3 = vpop.xlane.xlu0 %480 }
 0x2e6   :  { %1256 = vrcp.f32 %v481_v3 }
 0x2e7   :  { %498 = vadd.xlane.f32.xlu1 %v497_v52 }
 0x2ec   :  { %714 = vrot.lane.b32.xlu0 %v1650_v12, %s1461_s30  ;;  %v1257_v1 = vpop.eup %1256  ;;  %s1471_s30 = smov 8  }
 0x2ed   :  { %v509_v53 = vmul.f32 %v1257_v1, %v481_v3 }
 0x2ef   :  { %v517_v54 = vsub.f32 2.0, %v509_v53 }
 0x2f1   :  { %v525_v55 = vmul.f32 %v1257_v1, %v517_v54 }
 0x2f3   :  { %v1744_v13 = vmul.f32 %v1696_v4, %v525_v55 }
 0x2f5   :  { %v559_v56 = vpack.c.bf16 %v1744_v13, %v1744_v13 }
 0x2f7   :  { %1141 = vmatmul.msk.bf16.vlgmr.msra.gmra.mxu2 %vm240_vm2, %v559_v56 }
 0x317   :  { %v484_v14 = vpop.xlane.xlu1 %483 }
 0x318   :  { %1258 = vrcp.f32 %v484_v14 }
 0x31a   :  { %v487_v58 = vpop.xlane.xlu0 %486 }
 0x31b   :  { %1260 = vrcp.f32 %v487_v58 }
 0x31e   :  { %v1259_v59 = vpop.eup %1258 }
 0x31f   :  { %v510_v60 = vmul.f32 %v1259_v59, %v484_v14 }
 0x321   :  { %v1261_v61 = vpop.eup %1260  ;;  %v518_v12 = vsub.f32 2.0, %v510_v60 }
 0x322   :  { %v511_v62 = vmul.f32 %v1261_v61, %v487_v58  ;;  %v490_v63 = vpop.xlane.xlu2 %489 }
 0x323   :  { %v526_v0 = vmul.f32 %v1259_v59, %v518_v12  ;;  %1262 = vrcp.f32 %v490_v63  ;;  %v547_v59 = vsel %vm240_vm2, %v1744_v13, 0.0 }
 0x324   :  { %v519_v4 = vsub.f32 2.0, %v511_v62 }
 0x325   :  { %v534_v2 = vmul.f32 %v1700_v15, %v526_v0 }
 0x326   :  { %v527_v6 = vmul.f32 %v1261_v61, %v519_v4 }
 0x327   :  { %v560_v5 = vpack.c.bf16 %v534_v2, %v534_v2 }
 0x328   :  { %v535_v9 = vmul.f32 %v1704_v19, %v527_v6  ;;  %v541_v19 = vsel %vm240_vm2, %v534_v2, 0.0 }
 0x329   :  { %1142 = vmatmul.msk.bf16.vlgmr.msra.gmra.mxu3 %vm240_vm2, %v560_v5  ;;  %v1263_v8 = vpop.eup %1262  ;;  %v542_v33 = vadd.f32 %v541_v19, %v540_v30  ;;  %v1185_v19 = vld [vmem:[%s1869_s3] sm:$0xff] }
 0x32a   :  { %v512_v10 = vmul.f32 %v1263_v8, %v490_v63  ;;  %v561_v16 = vpack.c.bf16 %v535_v9, %v535_v9  ;;  %v548_v14 = vsel %vm240_vm2, %v535_v9, 0.0 }
 0x32b   :  { %v493_v7 = vpop.xlane.xlu0 %492  ;;  %v549_v12 = vadd.f32 %v548_v14, %v547_v59 }
 0x32c   :  { %1264 = vrcp.f32 %v493_v7  ;;  %v520_v17 = vsub.f32 2.0, %v512_v10 }
 0x32e   :  { %v528_v20 = vmul.f32 %v1263_v8, %v520_v17 }
 0x32f   :  { %v631_v48 = vpop.permute.xlu1 %630 }
 0x330   :  { %v636_v57 = vsel %vm571_vm3, %v631_v48, 0  ;;  %v536_v23 = vmul.f32 %v1708_v26, %v528_v20 }
 0x331   :  { %645 = vmatpush.bf16.msrb.mxu0 %v636_v57 }
 0x332   :  { %v1265_v15 = vpop.eup %1264  ;;  %v543_v31 = vsel %vm240_vm2, %v536_v23, 0.0  ;;  %v562_v52 = vpack.c.bf16 %v536_v23, %v536_v23 }
 0x333   :  { %v496_v18 = vpop.xlane.xlu0 %495  ;;  %v513_v21 = vmul.f32 %v1265_v15, %v493_v7  ;;  %v544_v39 = vadd.f32 %v543_v31, %v542_v33 }
 0x334   :  { %1266 = vrcp.f32 %v496_v18  ;;  %1143 = vmatmul.msk.bf16.vlgmr.msrb.gmra.mxu0 %vm240_vm2, %v561_v16 }
 0x335   :  { %v521_v25 = vsub.f32 2.0, %v513_v21 }
 0x337   :  { %v529_v34 = vmul.f32 %v1265_v15, %v521_v25 }
 0x339   :  { %v537_v42 = vmul.f32 %v1712_v35, %v529_v34 }
 0x33a   :  { %v1267_v22 = vpop.eup %1266 }
 0x33b   :  { %v514_v24 = vmul.f32 %v1267_v22, %v496_v18  ;;  %v563_v40 = vpack.c.bf16 %v537_v42, %v537_v42  ;;  %v550_v60 = vsel %vm240_vm2, %v537_v42, 0.0 }
 0x33c   :  { %v1756_v29 = vpop.f32.mrf.mxu1  ;;  %v551_v63 = vadd.f32 %v550_v60, %v549_v12 }
 0x33d   :  { %v522_v28 = vsub.f32 2.0, %v514_v24  ;;  %v1186_v24 = vld [vmem:[%s1869_s3 + $0x8] sm:$0xff] }
 0x33f   :  { %v530_v32 = vmul.f32 %v1267_v22, %v522_v28 }
 0x341   :  { %v538_v38 = vmul.f32 %v1719_v43, %v530_v32 }
 0x343   :  { %v545_v26 = vsel %vm240_vm2, %v538_v38, 0.0  ;;  %v564_v50 = vpack.c.bf16 %v538_v38, %v538_v38 }
 0x344   :  { %v546_v41 = vadd.f32 %v545_v26, %v544_v39  ;;  %v586_v44 = vpop.f32.mrf.mxu1 }
 0x346   :  { %v554_v45 = vmul.f32 0.25, %v546_v41  ;;  %v673_v46 = vpop.permute.xlu0 %672 }
 0x347   :  { %v678_v47 = vsel %vm571_vm3, %v673_v46, 0 }
 0x348   :  { %556 = vst.msk [vmem:[#allocation12] sm:$0xff] %vm240_vm2, %v554_v45  ;;  %687 = vmatpush.bf16.msrb.mxu2 %v678_v47 }
 0x34b   :  { %1145 = vmatmul.msk.bf16.vlgmr.msrb.gmra.mxu2 %vm240_vm2, %v563_v40  ;;  %v1231_v40 = vld [vmem:[%s1870_s4] ss:$0 sm:$0xff] }
 0x34e   :  { %v694_v49 = vpop.permute.xlu0 %693 }
 0x34f   :  { %v699_v43 = vsel %vm571_vm3, %v694_v49, 0 }
 0x350   :  { %708 = vmatpush.bf16.msrb.mxu3 %v699_v43 }
 0x353   :  { %1146 = vmatmul.msk.bf16.vlgmr.msrb.gmra.mxu3 %vm240_vm2, %v564_v50 }
 0x356   :  { %v652_v3 = vpop.permute.xlu0 %651 }
 0x357   :  { %v657_v35 = vsel %vm571_vm3, %v652_v3, 0 }
 0x358   :  { %666 = vmatpush.bf16.msrb.mxu1 %v657_v35 }
 0x35a   :  { %v499_v1 = vpop.xlane.xlu1 %498 }
 0x35b   :  { %1144 = vmatmul.msk.bf16.vlgmr.msrb.gmra.mxu1 %vm240_vm2, %v562_v52  ;;  %1268 = vrcp.f32 %v499_v1 }
 0x35c   :  { %797 = vmatpush.bf16.msra.mxu1 %v1186_v24 }
 0x35e   :  { %v715_v53 = vpop.permute.xlu0 %714 }
 0x35f   :  { %v720_v54 = vsel %vm571_vm3, %v715_v53, 0  ;;  %v1474_v53 = vmov 32.0  }
 0x360   :  { %729 = vmatpush.bf16.msra.mxu0 %v720_v54  ;;  %798 = vmatpush.bf16.msra.mxu1 %v1185_v19  ;;  %1270 = vrcp.f32 %v1474_v53 }
 0x361   :  { %v1269_v55 = vpop.eup %1268 }
 0x362   :  { %v515_v56 = vmul.f32 %v1269_v55, %v499_v1 }
 0x364   :  { %v523_v58 = vsub.f32 2.0, %v515_v56 }
 0x366   :  { %v531_v61 = vmul.f32 %v1269_v55, %v523_v58  ;;  %v1271_v54 = vpop.eup %1270 }
 0x367   :  { %v816_v55 = vmul.f32 32.0, %v1271_v54  ;;  %vm820_vm6 = vweird.f32 %v1271_v54 }
 0x368   :  { %v539_v62 = vmul.f32 %v1735_v51, %v531_v61 }
 0x369   :  { %v817_v56 = vsub.f32 1.0, %v816_v55 }
 0x36a   :  { %v552_v0 = vsel %vm240_vm2, %v539_v62, 0.0  ;;  %v565_v2 = vpack.c.bf16 %v539_v62, %v539_v62 }
 0x36b   :  { %v553_v4 = vadd.f32 %v552_v0, %v551_v63  ;;  %v818_v14 = vmul.f32 %v1271_v54, %v817_v56 }
 0x36c   :  { %1147 = vmatmul.msk.bf16.vlgmr.msra.gmra.mxu0 %vm240_vm2, %v565_v2 }
 0x36d   :  { %v555_v5 = vmul.f32 0.25, %v553_v4  ;;  %v819_v58 = vadd.f32 %v1271_v54, %v818_v14 }
 0x36f   :  { %557 = vst.msk [vmem:[#allocation12 + $0x8] sm:$0xff] %vm240_vm2, %v555_v5  ;;  %v1798_v59 = vsel %vm820_vm6, %v1271_v54, %v819_v58  ;;  %v1188_v5 = vld [vmem:[#allocation2 + $0x8] sm:$0xff] }
 0x370   :  { %900 = vmatpush.bf16.msra.mxu2 %v1188_v5 }
 0x37a   :  { %v605_v6 = vpop.f32.mrf.mxu2 }
 0x382   :  { %v607_v7 = vpop.f32.mrf.mxu2 }
 0x3ac   :  { %v626_v8 = vpop.f32.mrf.mxu3 }
 0x3b1   :  { %v647_v13 = vpop.f32.mrf.mxu0 }
 0x3b2   :  { %v1215_v9 = vpack.i.bf16 %v647_v13, %v626_v8  ;;  %v1187_v13 = vld [vmem:[#allocation2] sm:$0xff] }
 0x3b3   :  { %901 = vmatpush.bf16.msra.mxu2 %v1187_v13 }
 0x3b4   :  { %1216 = vrot.lane.b32.xlu2 %v1215_v9, %s1471_s30  ;;  %v628_v10 = vpop.f32.mrf.mxu3 }
 0x3b9   :  { %v649_v51 = vpop.f32.mrf.mxu0 }
 0x3ce   :  { %v689_v48 = vpop.f32.mrf.mxu2 }
 0x3d6   :  { %v691_v57 = vpop.f32.mrf.mxu2  ;;  %v710_v16 = vpop.f32.mrf.mxu3 }
 0x3d8   :  { %v668_v17 = vpop.f32.mrf.mxu1 }
 0x3d9   :  { %v1220_v18 = vpack.i.bf16 %v689_v48, %v668_v17 }
 0x3db   :  { %1221 = vrot.lane.b32.xlu1 %v1220_v18, %s1472_s22  ;;  %s1090_s22 = sshll.u32 %s1879_s13, 4  ;;  %s1478_s13 = smov 32   ;;  %s1091_s22 = int_to_ptr.hbm [resolvable:$true] %s1090_s22 }
 0x3de   :  { %v712_v15 = vpop.f32.mrf.mxu3 }
 0x3e0   :  { %v670_v20 = vpop.f32.mrf.mxu1 }
 0x3e9   :  { %v731_v21 = vpop.f32.mrf.mxu0 }
 0x3ea   :  { %v1225_v22 = vpack.i.bf16 %v731_v21, %v710_v16 }
 0x3ec   :  { %1226 = vrot.lane.b32.xlu0 %v1225_v22, %s1473_s23  ;;  %s1479_s23 = smov 2  }
 0x3f1   :  { %v733_v23 = vpop.f32.mrf.mxu0 }
 0x40e   :  { %v1217_v25 = vpop.permute.xlu2 %1216 }
 0x40f   :  { %v1219_v30 = vunpack.i.h.bf16 %v1217_v25  ;;  %v1218_v31 = vunpack.i.l.bf16 %v1217_v25  ;;  %v1232_v25 = vld [vmem:[%s1875_s9] ss:$0 sm:$0xff] }
 0x411   :  { %v760_v38 = vsel %vm240_vm2, %v605_v6, %v1219_v30  ;;  %v759_v39 = vsel %vm240_vm2, %v1756_v29, %v1218_v31 }
 0x44d   :  { %v1222_v28 = vpop.permute.xlu1 %1221 }
 0x44e   :  { %v1224_v32 = vunpack.i.h.bf16 %v1222_v28  ;;  %v1223_v33 = vunpack.i.l.bf16 %v1222_v28 }
 0x450   :  { %v762_v42 = vsel %vm761_vm4, %v759_v39, %v1223_v33  ;;  %v763_v44 = vsel %vm761_vm4, %v760_v38, %v1224_v32  ;;  %v1233_v32 = vld [vmem:[#allocation8] ss:$0 sm:$0xff] }
 0x45e   :  { %v1227_v34 = vpop.permute.xlu0 %1226 }
 0x45f   :  { %v1229_v26 = vunpack.i.h.bf16 %v1227_v34  ;;  %v1228_v41 = vunpack.i.l.bf16 %v1227_v34 }
 0x461   :  { %v765_v45 = vsel %vm764_vm5, %v762_v42, %v1228_v41  ;;  %v766_v46 = vsel %vm764_vm5, %v763_v44, %v1229_v26  ;;  %v1192_v42 = vld [vmem:[%s1873_s7 + $0x18] sm:$0xff]  ;;  %v1191_v44 = vld [vmem:[%s1873_s7 + $0x10] sm:$0xff]  ;;  %vm1075_vm5 = vcmask 254976  }
 0x462   :  { %v767_v47 = vpack.c.bf16 %v766_v46, %v765_v45  ;;  %955 = vmatpush.bf16.msra.mxu3 %v1192_v42  ;;  %v1190_v45 = vld [vmem:[%s1873_s7 + $0x8] sm:$0xff]  ;;  %v1189_v46 = vld [vmem:[%s1873_s7] sm:$0xff]  ;;  %s1475_s7 = smov [#allocation12]  }
 0x463   :  { %s1101_s18 = sshll.u32 %s1475_s7, 4  ;;  %s1102_s18 = int_to_ptr.vmem [resolvable:$true] %s1101_s18 }
 0x464   :  { %1156 = vmatmul.msk.bf16.vlgmr.msra.gmra.mxu1 %vm189_vm1, %v767_v47  ;;  %1109 = dma.vmem_to_hbm [thread:$0]  %s1102_s18, 256, %s1104_s20, [#allocation13], %s1476_s8, %s1476_s8, %s1471_s30  }
 0x466   :  { %956 = vmatpush.bf16.msra.mxu3 %v1191_v44 }
 0x46a   :  { %957 = vmatpush.bf16.msra.mxu3 %v1190_v45 }
 0x46e   :  { %958 = vmatpush.bf16.msra.mxu3 %v1189_v46 }
 0x4e1   :  { %v800_v49 = vpop.f32.mrf.mxu1 }
 0x4e2   :  { %v801_v43 = vadd.f32 %v1231_v40, %v800_v49 }
 0x4e4   :  { %v805_v50 = vadd.f32 %v801_v43, %v1622_v37 }
 0x4e6   :  { %v809_v3 = vsel %vm189_vm1, %v805_v50, 0.0 }
 0x4e7   :  { %810 = vadd.xlane.f32.xlu0 %v809_v3 }
 0x4e9   :  { %v802_v29 = vpop.f32.mrf.mxu1 }
 0x4ea   :  { %v803_v35 = vadd.f32 %v1231_v40, %v802_v29  ;;  %v1234_v40 = vld [vmem:[#allocation5] ss:$0 sm:$0xff] }
 0x4ec   :  { %v806_v52 = vadd.f32 %v803_v35, %v1619_v36 }
 0x4ee   :  { %v812_v1 = vsel %vm189_vm1, %v806_v52, 0.0 }
 0x4ef   :  { %813 = vadd.xlane.f32.xlu2 %v812_v1 }
 0x55a   :  { %v811_v37 = vpop.xlane.xlu0 %810 }
 0x55b   :  { %v822_v60 = vmul.f32 %v1798_v59, %v811_v37 }
 0x55d   :  { %v824_v61 = vsub.f32 %v805_v50, %v822_v60 }
 0x55f   :  { %v826_v12 = vmul.f32 %v824_v61, %v824_v61 }
 0x561   :  { %v828_v36 = vsel %vm189_vm1, %v826_v12, 0.0 }
 0x562   :  { %v814_v62 = vpop.xlane.xlu2 %813  ;;  %829 = vadd.xlane.f32.xlu1 %v828_v36 }
 0x563   :  { %v823_v63 = vmul.f32 %v1798_v59, %v814_v62 }
 0x565   :  { %v825_v0 = vsub.f32 %v806_v52, %v823_v63  ;;  %v1235_v52 = vld [vmem:[#allocation7] ss:$0 sm:$0xff] }
 0x567   :  { %v827_v2 = vmul.f32 %v825_v0, %v825_v0 }
 0x569   :  { %v831_v4 = vsel %vm189_vm1, %v827_v2, 0.0 }
 0x56a   :  { %832 = vadd.xlane.f32.xlu0 %v831_v4 }
 0x5d5   :  { %v830_v6 = vpop.xlane.xlu1 %829 }
 0x5d6   :  { %v834_v7 = vmul.f32 %v830_v6, %v1798_v59 }
 0x5d8   :  { %v836_v8 = vadd.f32 1e-05, %v834_v7 }
 0x5da   :  { %1272 = vrsqrt.f32 %v836_v8  ;;  %vm844_vm8 = vweird.f32 %v836_v8 }
 0x5dd   :  { %v833_v9 = vpop.xlane.xlu0 %832 }
 0x5de   :  { %v835_v10 = vmul.f32 %v833_v9, %v1798_v59 }
 0x5e0   :  { %v1273_v51 = vpop.eup %1272  ;;  %v837_v48 = vadd.f32 1e-05, %v835_v10 }
 0x5e1   :  { %v839_v57 = vmul.f32 %v1273_v51, %v836_v8  ;;  %vm845_vm7 = vweird.f32 %v1273_v51 }
 0x5e2   :  { %1274 = vrsqrt.f32 %v837_v48  ;;  %vm846_vm9 = vmor %vm844_vm8, %vm845_vm7  ;;  %vm854_vm11 = vweird.f32 %v837_v48 }
 0x5e3   :  { %v840_v16 = vmul.f32 %v1273_v51, %v839_v57 }
 0x5e5   :  { %v841_v17 = vmul.f32 0.5, %v840_v16 }
 0x5e7   :  { %v842_v18 = vsub.f32 1.5, %v841_v17 }
 0x5e8   :  { %v1275_v15 = vpop.eup %1274 }
 0x5e9   :  { %v843_v20 = vmul.f32 %v1273_v51, %v842_v18  ;;  %v849_v21 = vmul.f32 %v1275_v15, %v837_v48  ;;  %vm855_vm10 = vweird.f32 %v1275_v15 }
 0x5ea   :  { %vm856_vm12 = vmor %vm854_vm11, %vm855_vm10 }
 0x5eb   :  { %v850_v22 = vmul.f32 %v1275_v15, %v849_v21  ;;  %v847_v23 = vsel %vm846_vm9, %v1273_v51, %v843_v20  ;;  %v1236_v21 = vld [vmem:[%s1877_s11] ss:$0 sm:$0xff]  ;;  %s1477_s11 = smov [#allocation11]  }
 0x5ec   :  { %v858_v28 = vmul.f32 %v847_v23, %v824_v61  ;;  %s1088_s12 = sshll.u32 %s1477_s11, 4  ;;  %s1089_s12 = int_to_ptr.vmem [resolvable:$true] %s1088_s12 }
 0x5ed   :  { %v851_v24 = vmul.f32 0.5, %v850_v22 }
 0x5ee   :  { %v863_v33 = vmul.f32 %v1232_v25, %v858_v28 }
 0x5ef   :  { %v852_v19 = vsub.f32 1.5, %v851_v24 }
 0x5f0   :  { %v868_v39 = vadd.f32 %v1233_v32, %v863_v33 }
 0x5f1   :  { %v853_v30 = vmul.f32 %v1275_v15, %v852_v19 }
 0x5f3   :  { %v857_v31 = vsel %vm856_vm12, %v1275_v15, %v853_v30 }
 0x5f4   :  { %v859_v34 = vmul.f32 %v857_v31, %v825_v0 }
 0x5f6   :  { %v864_v38 = vmul.f32 %v1232_v25, %v859_v34 }
 0x5f8   :  { %v869_v26 = vadd.f32 %v1233_v32, %v864_v38 }
 0x5fa   :  { %v870_v41 = vpack.c.bf16 %v869_v26, %v868_v39 }
 0x5fc   :  { %1165 = vmatmul.msk.bf16.vlgmr.msra.gmra.mxu2 %vm189_vm1, %v870_v41 }
 0x67f   :  { %v903_v47 = vpop.f32.mrf.mxu2 }
 0x680   :  { %v904_v49 = vadd.f32 %v1234_v40, %v903_v47 }
 0x682   :  { %v908_v3 = vmax.f32 %v904_v49, 0.0 }
 0x687   :  { %v905_v43 = vpop.f32.mrf.mxu2 }
 0x688   :  { %v906_v50 = vadd.f32 %v1234_v40, %v905_v43 }
 0x68a   :  { %v909_v29 = vmax.f32 %v906_v50, 0.0 }
 0x68c   :  { %v910_v35 = vpack.c.bf16 %v909_v29, %v908_v3 }
 0x68e   :  { %1182 = vmatmul.msk.bf16.vlgmr.msra.gmra.mxu3 %vm947_vm13, %v910_v35 }
 0x711   :  { %v960_v1 = vpop.f32.mrf.mxu3 }
 0x712   :  { %v961_v53 = vadd.f32 %v1235_v52, %v960_v1 }
 0x714   :  { %v965_v54 = vadd.f32 %v961_v53, %v868_v39 }
 0x716   :  { %v969_v55 = vsel %vm189_vm1, %v965_v54, 0.0 }
 0x717   :  { %970 = vadd.xlane.f32.xlu0 %v969_v55 }
 0x719   :  { %v962_v56 = vpop.f32.mrf.mxu3 }
 0x71a   :  { %v963_v14 = vadd.f32 %v1235_v52, %v962_v56 }
 0x71c   :  { %v966_v58 = vadd.f32 %v963_v14, %v869_v26 }
 0x71e   :  { %v972_v37 = vsel %vm189_vm1, %v966_v58, 0.0 }
 0x71f   :  { %973 = vadd.xlane.f32.xlu2 %v972_v37 }
 0x78a   :  { %v971_v60 = vpop.xlane.xlu0 %970 }
 0x78b   :  { %v975_v61 = vmul.f32 %v971_v60, %v1798_v59 }
 0x78d   :  { %v977_v12 = vsub.f32 %v965_v54, %v975_v61 }
 0x78f   :  { %v979_v36 = vmul.f32 %v977_v12, %v977_v12 }
 0x791   :  { %v981_v62 = vsel %vm189_vm1, %v979_v36, 0.0 }
 0x792   :  { %v974_v63 = vpop.xlane.xlu2 %973  ;;  %982 = vadd.xlane.f32.xlu0 %v981_v62 }
 0x793   :  { %v976_v0 = vmul.f32 %v974_v63, %v1798_v59 }
 0x795   :  { %v978_v2 = vsub.f32 %v966_v58, %v976_v0 }
 0x797   :  { %v980_v4 = vmul.f32 %v978_v2, %v978_v2 }
 0x799   :  { %v984_v5 = vsel %vm189_vm1, %v980_v4, 0.0 }
 0x79a   :  { %985 = vadd.xlane.f32.xlu1 %v984_v5 }
 0x805   :  { %v983_v6 = vpop.xlane.xlu0 %982 }
 0x806   :  { %v987_v7 = vmul.f32 %v983_v6, %v1798_v59 }
 0x808   :  { %v989_v8 = vadd.f32 1e-05, %v987_v7 }
 0x80a   :  { %1276 = vrsqrt.f32 %v989_v8  ;;  %vm997_vm15 = vweird.f32 %v989_v8 }
 0x80d   :  { %v986_v13 = vpop.xlane.xlu1 %985 }
 0x80e   :  { %v988_v9 = vmul.f32 %v986_v13, %v1798_v59  ;;  %v1237_v59 = vld [vmem:[#allocation10] ss:$0 sm:$0xff] }
 0x810   :  { %v1277_v10 = vpop.eup %1276  ;;  %v990_v51 = vadd.f32 1e-05, %v988_v9 }
 0x811   :  { %v992_v48 = vmul.f32 %v1277_v10, %v989_v8  ;;  %vm998_vm14 = vweird.f32 %v1277_v10 }
 0x812   :  { %1278 = vrsqrt.f32 %v990_v51  ;;  %vm999_vm1 = vmor %vm997_vm15, %vm998_vm14  ;;  %vm1007_vm3 = vweird.f32 %v990_v51 }
 0x813   :  { %v993_v57 = vmul.f32 %v1277_v10, %v992_v48 }
 0x815   :  { %v994_v16 = vmul.f32 0.5, %v993_v57 }
 0x817   :  { %v995_v17 = vsub.f32 1.5, %v994_v16 }
 0x818   :  { %v1279_v18 = vpop.eup %1278 }
 0x819   :  { %v996_v15 = vmul.f32 %v1277_v10, %v995_v17  ;;  %v1002_v20 = vmul.f32 %v1279_v18, %v990_v51  ;;  %vm1008_vm2 = vweird.f32 %v1279_v18 }
 0x81a   :  { %vm1009_vm4 = vmor %vm1007_vm3, %vm1008_vm2 }
 0x81b   :  { %v1000_v22 = vsel %vm999_vm1, %v1277_v10, %v996_v15  ;;  %v1003_v23 = vmul.f32 %v1279_v18, %v1002_v20 }
 0x81c   :  { %v1011_v24 = vmul.f32 %v1000_v22, %v977_v12 }
 0x81d   :  { %v1004_v19 = vmul.f32 0.5, %v1003_v23 }
 0x81e   :  { %v1016_v25 = vmul.f32 %v1236_v21, %v1011_v24 }
 0x81f   :  { %v1005_v28 = vsub.f32 1.5, %v1004_v19 }
 0x820   :  { %v1021_v30 = vadd.f32 %v1237_v59, %v1016_v25 }
 0x821   :  { %v1006_v31 = vmul.f32 %v1279_v18, %v1005_v28 }
 0x822   :  { %v1023_v32 = vrot.slane %v1021_v30, 4  ;;  %v1028_v39 = vperm.slane %v1021_v30, %v1599_v11 }
 0x823   :  { %v1010_v33 = vsel %vm1009_vm4, %v1279_v18, %v1006_v31 }
 0x824   :  { %v1012_v34 = vmul.f32 %v1010_v33, %v978_v2  ;;  %v1024_v38 = vsel %vm128_vm0, 0.0, %v1023_v32  ;;  %v1045_v44 = vrot.slane %v1028_v39, 4 }
 0x825   :  { %v1032_v42 = vperm.slane %v1024_v38, %v1599_v11 }
 0x826   :  { %v1017_v26 = vmul.f32 %v1236_v21, %v1012_v34 }
 0x827   :  { %v1057_v43 = vrot.slane %v1032_v42, 4 }
 0x828   :  { %v1022_v41 = vadd.f32 %v1237_v59, %v1017_v26 }
 0x82a   :  { %v1033_v45 = vrot.slane %v1022_v41, 4  ;;  %v1038_v46 = vperm.slane %v1022_v41, %v1599_v11 }
 0x82c   :  { %v1034_v47 = vsel %vm128_vm0, 0.0, %v1033_v45  ;;  %v1043_v40 = vrot.slane %v1038_v46, 4  ;;  %v1046_v49 = vsel %vm128_vm0, %v1038_v46, %v1045_v44 }
 0x82d   :  { %v1042_v50 = vperm.slane %v1034_v47, %v1599_v11  ;;  %v1054_v3 = vperm.slane %v1046_v49, %v1612_v27 }
 0x82e   :  { %v1044_v29 = vsel %vm128_vm0, %v1043_v40, %v1028_v39 }
 0x82f   :  { %v1050_v35 = vperm.slane %v1044_v29, %v1612_v27  ;;  %v1055_v52 = vrot.slane %v1042_v50, 4  ;;  %v1058_v1 = vsel %vm128_vm0, %v1042_v50, %v1057_v43  ;;  %v1069_v53 = vrot.slane %v1054_v3, 4  ;;  %1078 = vst.msk [vmem:[#allocation11 + $0x4] sm:$0x3] %vm1075_vm5, %v1054_v3 }
 0x830   :  { %v1066_v54 = vperm.slane %v1058_v1, %v1612_v27 }
 0x831   :  { %v1056_v55 = vsel %vm128_vm0, %v1055_v52, %v1032_v42  ;;  %v1067_v56 = vrot.slane %v1050_v35, 4  ;;  %v1070_v14 = vsel %vm128_vm0, 0.0, %v1069_v53  ;;  %1076 = vst.msk [vmem:[#allocation11] sm:$0x3] %vm1075_vm5, %v1050_v35 }
 0x832   :  { %v1062_v11 = vperm.slane %v1056_v55, %v1612_v27  ;;  %v1073_v58 = vrot.slane %v1066_v54, 4  ;;  %1079 = vst.msk [vmem:[#allocation11 + $0x6] sm:$0x3] %vm1075_vm5, %v1070_v14 }
 0x833   :  { %v1068_v37 = vsel %vm128_vm0, 0.0, %v1067_v56  ;;  %1082 = vst.msk [vmem:[#allocation11 + $0xc] sm:$0x3] %vm1075_vm5, %v1066_v54 }
 0x834   :  { %v1071_v60 = vrot.slane %v1062_v11, 4  ;;  %v1074_v61 = vsel %vm128_vm0, 0.0, %v1073_v58  ;;  %1077 = vst.msk [vmem:[#allocation11 + $0x2] sm:$0x3] %vm1075_vm5, %v1068_v37 }
 0x835   :  { %1080 = vst.msk [vmem:[#allocation11 + $0x8] sm:$0x3] %vm1075_vm5, %v1062_v11 }
 0x836   :  { %v1072_v12 = vsel %vm128_vm0, 0.0, %v1071_v60  ;;  %1083 = vst.msk [vmem:[#allocation11 + $0xe] sm:$0x3] %vm1075_vm5, %v1074_v61 }
 0x837   :  { %1081 = vst.msk [vmem:[#allocation11 + $0xa] sm:$0x3] %vm1075_vm5, %v1072_v12 }
 0x838   :  { %1096 = dma.vmem_to_hbm [thread:$0]  %s1089_s12, 256, %s1091_s22, [#allocation4], %s1478_s13, %s1478_s13, %s1479_s23  }
 0x839   :  { %1454 = dma.done.wait [#allocation4], 256  }
 0x83a   :  { %1455 = vsyncadd [#allocation4], 4294967040 }
 0x83b   :  { %1456 = dma.done.wait [#allocation13], 256  }
 0x83c   :  { %1457 = vsyncadd [#allocation13], 4294967040 }
 0x83d   :  { %1118 = vsyncpa [#allocation3], 1 }
 0x83e   :  { %1119 = vsyncpa [#allocation6], 1 }
 0x83f   :  { %1120 = vsyncpa [#allocation9], 1 }
 0x840   :  { %1121 = vsyncpa [#allocation4], 1 }
 0x841   :  { %1122 = vsyncpa [#allocation13], 1 }

</bundles_post_ra>
